<compile_context>
chip_gen: v7x
topology: tpu7x:2x2x1
jax: 0.10.0
libtpu: 0.0.40
codegen_flags: <defaults>
</compile_context>

<pallas_src>
import numpy as np
import jax
import jax.numpy as jnp
from jax import lax
from jax.experimental import pallas as pl
from jax.experimental.pallas import tpu as pltpu

# ----- problem sizes (small, consistent with the module) -----
N, C_IN, H, W = 2, 4, 16, 16
STRIDE = 1
EXPAND = 6
C_OUT = C_IN                       # inp == oup and stride == 1 -> use_res_connect = True
CM = round(C_IN * EXPAND)          # hidden_dim = 24
HW = H * W                         # 256 spatial positions per image (lane axis)
EPS = 1e-5
TAPS = [(dy, dx) for dy in (-1, 0, 1) for dx in (-1, 0, 1)]   # row-major 3x3 taps


# ---------------------------------------------------------------------------
# One-time hardware probe: detect the rotation convention of pltpu.roll so the
# per-tap lane shifts are sign-correct regardless of convention.
# ---------------------------------------------------------------------------
def _roll_probe_kernel(x_ref, o_ref):
    o_ref[...] = pltpu.roll(x_ref[...], 1, axis=1)


def detect_roll_sign():
    x = jnp.broadcast_to(jnp.arange(128, dtype=jnp.float32)[None, :], (8, 128))
    out = pl.pallas_call(
        _roll_probe_kernel,
        out_shape=jax.ShapeDtypeStruct((8, 128), jnp.float32),
    )(x)
    row = np.asarray(jax.block_until_ready(out))[0]
    base = np.arange(128, dtype=np.float32)
    if np.array_equal(row, np.roll(base, 1)):
        return 1      # pltpu.roll(x, s)[i] == x[i - s]   (jnp.roll convention)
    if np.array_equal(row, np.roll(base, -1)):
        return -1     # pltpu.roll(x, s)[i] == x[i + s]
    return 1


# ---------------------------------------------------------------------------
# Kernel: one batch image per grid step, everything in lane-dense (C, HW) layout.
# ---------------------------------------------------------------------------
def make_kernel(tap_shifts):
    def kernel(x_ref, w1_ref, b1_ref, wm_ref, b2_ref, w3_ref, b3_ref, o_ref):
        x = x_ref[...]                                                   # (C_IN, HW)

        # --- 1x1 expand conv (BN scale pre-folded into w1) + bias + ReLU6 ---
        y = jnp.dot(w1_ref[...], x, preferred_element_type=jnp.float32)  # (CM, HW)
        y = jnp.clip(y + b1_ref[...], 0.0, 6.0)

        # --- 3x3 depthwise conv (stride 1, zero-pad 1): XLU lane rolls +
        #     per-tap (boundary-mask x BN-scaled weight) VPU FMAs ---
        acc = jnp.zeros((CM, HW), jnp.float32)
        for t, shift in enumerate(tap_shifts):                           # static unroll (9)
            ys = y if shift == 0 else pltpu.roll(y, shift, axis=1)
            acc = acc + ys * wm_ref[t]                                   # wm[t]: (CM, HW)
        z = jnp.clip(acc + b2_ref[...], 0.0, 6.0)

        # --- 1x1 project conv (BN scale pre-folded into w3) + bias + residual ---
        o = jnp.dot(w3_ref[...], z, preferred_element_type=jnp.float32)  # (C_OUT, HW)
        o_ref[...] = x + o + b3_ref[...]
    return kernel


def inverted_residual(x_cl, w1e, b1, wm, b2, w3e, b3, roll_sign):
    # desired: shifted[p] = y[p + (dy*W + dx)]  ->  jnp-style shift = -(dy*W+dx),
    # mapped through the detected pltpu.roll convention and taken mod HW (non-negative).
    tap_shifts = tuple(int((roll_sign * (-(dy * W + dx))) % HW) for dy, dx in TAPS)
    const2 = lambda n: (0, 0)
    const3 = lambda n: (0, 0, 0)
    return pl.pallas_call(
        make_kernel(tap_shifts),
        out_shape=jax.ShapeDtypeStruct((C_OUT, N * HW), jnp.float32),
        grid=(N,),
        in_specs=[
            pl.BlockSpec((C_IN, HW), lambda n: (0, n)),    # x: one image's lanes per step
            pl.BlockSpec((CM, C_IN), const2),              # expand weight (BN-folded)
            pl.BlockSpec((CM, 1), const2),                 # expand bias
            pl.BlockSpec((9, CM, HW), const3),             # depthwise mask*weight per tap
            pl.BlockSpec((CM, 1), const2),                 # depthwise bias
            pl.BlockSpec((C_OUT, CM), const2),             # project weight (BN-folded)
            pl.BlockSpec((C_OUT, 1), const2),              # project bias
        ],
        out_specs=pl.BlockSpec((C_OUT, HW), lambda n: (0, n)),
        compiler_params=pltpu.CompilerParams(dimension_semantics=("parallel",)),
    )(x_cl, w1e, b1, wm, b2, w3e, b3)


# ---------------------------------------------------------------------------
# Host-side parameter preparation
# ---------------------------------------------------------------------------
def build_tap_masks():
    """(9, HW) 0/1 masks encoding zero-padding validity of each 3x3 tap."""
    m = np.zeros((9, HW), np.float32)
    for t, (dy, dx) in enumerate(TAPS):
        for h in range(H):
            for w in range(W):
                if 0 <= h + dy < H and 0 <= w + dx < W:
                    m[t, h * W + w] = 1.0
    return m


def fold_bn(gamma, beta, mean, var):
    scale = gamma / jnp.sqrt(var + EPS)
    bias = beta - mean * scale
    return scale, bias


def reference_nchw(x, w1_oihw, bn1, dw_oihw, bn2, w3_oihw, bn3):
    dn = ('NCHW', 'OIHW', 'NCHW')
    s1, b1 = fold_bn(*bn1)
    s2, b2 = fold_bn(*bn2)
    s3, b3 = fold_bn(*bn3)
    y = lax.conv_general_dilated(x, w1_oihw, (1, 1), 'VALID', dimension_numbers=dn)
    y = jnp.clip(y * s1[None, :, None, None] + b1[None, :, None, None], 0.0, 6.0)
    z = lax.conv_general_dilated(y, dw_oihw, (STRIDE, STRIDE), ((1, 1), (1, 1)),
                                 dimension_numbers=dn, feature_group_count=CM)
    z = jnp.clip(z * s2[None, :, None, None] + b2[None, :, None, None], 0.0, 6.0)
    o = lax.conv_general_dilated(z, w3_oihw, (1, 1), 'VALID', dimension_numbers=dn)
    o = o * s3[None, :, None, None] + b3[None, :, None, None]
    return x + o


if __name__ == "__main__":
    key = jax.random.PRNGKey(0)
    keys = jax.random.split(key, 16)

    # ----- deterministic synthetic parameters (PyTorch conv/BN shapes) -----
    w1_oihw = jax.random.normal(keys[0], (CM, C_IN, 1, 1), jnp.float32) * 0.2
    dw_oihw = jax.random.normal(keys[1], (CM, 1, 3, 3), jnp.float32) * 0.2
    w3_oihw = jax.random.normal(keys[2], (C_OUT, CM, 1, 1), jnp.float32) * 0.2

    def make_bn(k, ch):
        k1, k2, k3, k4 = jax.random.split(k, 4)
        gamma = 1.0 + 0.1 * jax.random.normal(k1, (ch,), jnp.float32)
        beta = 0.1 * jax.random.normal(k2, (ch,), jnp.float32)
        mean = 0.1 * jax.random.normal(k3, (ch,), jnp.float32)
        var = jax.random.uniform(k4, (ch,), jnp.float32, 0.5, 1.5)
        return gamma, beta, mean, var

    bn1 = make_bn(keys[3], CM)
    bn2 = make_bn(keys[4], CM)
    bn3 = make_bn(keys[5], C_OUT)

    # ----- input (NCHW, as PyTorch) -----
    x_nchw = jax.random.normal(keys[6], (N, C_IN, H, W), jnp.float32)

    # ----- fold BN scales into weights; keep only biases for the kernel -----
    s1, b1 = fold_bn(*bn1)
    s2, b2 = fold_bn(*bn2)
    s3, b3 = fold_bn(*bn3)

    w1e = w1_oihw[:, :, 0, 0] * s1[:, None]                      # (CM, C_IN)
    w3e = w3_oihw[:, :, 0, 0] * s3[:, None]                      # (C_OUT, CM)
    # depthwise taps, (dy,dx) row-major, BN scale folded in: (9, CM)
    dw_taps = jnp.transpose(dw_oihw[:, 0, :, :], (1, 2, 0)).reshape(9, CM) * s2[None, :]
    # combine per-tap zero-pad mask with the per-channel tap weight: (9, CM, HW)
    masks = jnp.asarray(build_tap_masks())                       # (9, HW)
    wm = dw_taps[:, :, None] * masks[:, None, :]                 # (9, CM, HW)

    b1c = b1.reshape(CM, 1)
    b2c = b2.reshape(CM, 1)
    b3c = b3.reshape(C_OUT, 1)

    # input: NCHW -> (C, N*HW) — channels on sublanes, spatial on lanes
    x_cl = jnp.transpose(x_nchw, (1, 0, 2, 3)).reshape(C_IN, N * HW)

    roll_sign = detect_roll_sign()

    out_cl = inverted_residual(x_cl, w1e, b1c, wm, b2c, w3e, b3c, roll_sign)
    out_cl = jax.block_until_ready(out_cl)
    out_nchw = jnp.transpose(out_cl.reshape(C_OUT, N, H, W), (1, 0, 2, 3))

    ref = reference_nchw(x_nchw, w1_oihw, bn1, dw_oihw, bn2, w3_oihw, bn3)
    assert jnp.allclose(out_nchw, ref, atol=2e-4, rtol=2e-4), "mismatch vs JAX reference"

    print("KERNEL_OK")
</pallas_src>

<mosaic_0001>
module attributes {stable_mosaic.version = 11 : i64} {
  func.func @_roll_probe_kernel(%arg0: memref<8x128xf32, #tpu.memory_space<vmem>>, %arg1: memref<8x128xf32, #tpu.memory_space<vmem>>) attributes {dimension_semantics = [], scalar_prefetch = 0 : i64, scratch_operands = 0 : i64, tpu.core_type = #tpu.core_type<tc>} {
    %c0 = arith.constant 0 : index
    %c0_0 = arith.constant 0 : index
    %0 = vector.load %arg0[%c0, %c0_0] : memref<8x128xf32, #tpu.memory_space<vmem>>, vector<8x128xf32>
    %c1_i32 = arith.constant 1 : i32
    %1 = tpu.dynamic_rotate %0 by %c1_i32 dim 1 : vector<8x128xf32>, i32 -> vector<8x128xf32>
    %c0_1 = arith.constant 0 : index
    %c0_2 = arith.constant 0 : index
    %2 = vector.load %arg1[%c0_1, %c0_2] : memref<8x128xf32, #tpu.memory_space<vmem>>, vector<8x128xf32>
    tpu.vector_store %arg1[%c0_1, %c0_2], %1 {strides = array<i32>} : memref<8x128xf32, #tpu.memory_space<vmem>>, vector<8x128xf32>,
    return
  }
}

</mosaic_0001>

<bundles_post_ra>
// kernel: tpu_custom_call.1
= control target key start
LH: loop header
LB: loop body
LE: loop exit
PB: predicated region body
PF: predicated region fallthrough
CT: control target
= control target key end

     0   :  { %6 = vsyncpa [#allocation3], 0  ;;  %s128_s0 = inlined_call_operand.hbm [shape: f32[8,128], index: 0, kind: input, shape index: {}]   ;;  %s129_s1 = inlined_call_operand.hbm [shape: f32[8,128], index: 1, kind: output, shape index: {}]  }
   0x1   :  { %7 = vsyncpa [#allocation4], 0  ;;  %s91_s6 = smov [#allocation2]   ;;  %s43_s10 = scalar_lea.hbm %s128_s0, 128 }
   0x2   :  { %s14_s7 = sshll.u32 %s91_s6, 4  ;;  %p44_p0 = scmp.ne.s32.totalorder %s128_s0, %s43_s10  ;;  %s15_s7 = int_to_ptr.vmem [resolvable:$true] %s14_s7 }
   0x3   :  { %p47_p1 = scmp.lt.u32.totalorder %s43_s10, %s128_s0 }
   0x5   :  { %p49_p2 = pnand %p47_p1, %p44_p0 }
   0x7   :  { %52 = shalt.err (!%p49_p2)
}
   0x8   :  { %s53_s15 = scalar_lea.vmem %s15_s7, 128  ;;  %p58_p4 = scmp.lt.s32.totalorder %s15_s7, %s15_s7 }
   0x9   :  { %p54_p3 = scmp.ne.s32.totalorder %s15_s7, %s53_s15  ;;  %p59_p5 = scmp.lt.s32.totalorder %s53_s15, %s53_s15 }
   0xb   :  { %p60_p6 = por %p59_p5, %p58_p4 }
   0xd   :  { %p61_p7 = pnand %p60_p6, %p54_p3 }
   0xf   :  { %64 = shalt.err (!%p61_p7)
}
  0x10   :  { %17 = dma.hbm_to_vmem [thread:$0]  %s128_s0, 128, %s15_s7, [#allocation3]  }
  0x11   :  { %87 = dma.done.wait [#allocation3], 128  }
  0x12   :  { %88 = vsyncadd [#allocation3], 4294967168  ;;  %v21_v0 = vld [vmem:[#allocation2] sm:$0xff]  ;;  %s92_s18 = smov 1   ;;  %s93_s19 = smov [#allocation5]  }
  0x13   :  { %22 = vrot.lane.b32.xlu0 %v21_v0, %s92_s18  ;;  %s31_s20 = sshll.u32 %s93_s19, 4  ;;  %s32_s20 = int_to_ptr.vmem [resolvable:$true] %s31_s20 }
  0x14   :  { %s65_s21 = scalar_lea.vmem %s32_s20, 128  ;;  %p70_p9 = scmp.lt.s32.totalorder %s32_s20, %s32_s20 }
  0x15   :  { %p66_p8 = scmp.ne.s32.totalorder %s32_s20, %s65_s21  ;;  %p71_p10 = scmp.lt.s32.totalorder %s65_s21, %s65_s21 }
  0x17   :  { %p72_p11 = por %p71_p10, %p70_p9 }
  0x19   :  { %p73_p12 = pnand %p72_p11, %p66_p8 }
  0x85   :  { %v23_v1 = vpop.permute.xlu0 %22 }
  0x86   :  { %24 = vst [vmem:[#allocation5] sm:$0xff] %v23_v1 }
  0x87   :  { %76 = shalt.err (!%p73_p12)
}
  0x88   :  { %s77_s0 = scalar_lea.hbm %s129_s1, 128 }
  0x89   :  { %p78_p13 = scmp.ne.s32.totalorder %s129_s1, %s77_s0  ;;  %p81_p0 = scmp.lt.u32.totalorder %s77_s0, %s129_s1 }
  0x8b   :  { %p83_p1 = pnand %p81_p0, %p78_p13 }
  0x8d   :  { %86 = shalt.err (!%p83_p1)
}
  0x8e   :  { %34 = dma.vmem_to_hbm [thread:$0]  %s32_s20, 128, %s129_s1, [#allocation4]  }
  0x8f   :  { %89 = dma.done.wait [#allocation4], 128  }
  0x90   :  { %90 = vsyncadd [#allocation4], 4294967168 }
  0x91   :  { %38 = vsyncpa [#allocation3], 1 }
  0x92   :  { %39 = vsyncpa [#allocation4], 1 }

</bundles_post_ra>
